<compile_context>
chip_gen: v6e
topology: v6e:2x2x1
jax: 0.10.0
libtpu: 0.0.40
codegen_flags: <defaults>
</compile_context>

<pallas_src>
import functools

import jax
import jax.numpy as jnp
from jax.experimental import pallas as pl
from jax.experimental.pallas import tpu as pltpu


def _round_up(x, m):
    return (x + m - 1) // m * m


# ----------------------------------------------------------------------------
# Pallas kernel: fused separable box filter for one (batch, channel-block)
# ----------------------------------------------------------------------------
def _box_filter_kernel(x_ref, out_ref, xpad_ref, *, r, h, w, w_lane, th):
    """x_ref   : (1, cb, H, W)             raw (unpadded) input block
       out_ref : (1, cb, H, W_lane)        lane-dense output block
       xpad_ref: (cb, H+2r, W_lane+2r) f32 VMEM scratch (zero-padded frame)"""
    k = 2 * r + 1
    inv_k2 = jnp.float32(1.0 / float(k * k))

    # In-VMEM zero padding: clear the scratch, then drop the input block into
    # its interior. Columns >= r+W stay zero, so the extra W_lane-W output
    # columns are harmless and get sliced off by the wrapper.
    xpad_ref[...] = jnp.zeros_like(xpad_ref)
    xpad_ref[:, r:r + h, r:r + w] = x_ref[0].astype(jnp.float32)

    # Process H in sublane-aligned bands so the f32 intermediate stays small
    # (cuts intermediate VMEM traffic vs. a full (cb, H, Ws) accumulator).
    for y0 in range(0, h, th):
        tb = min(th, h - y0)
        xp = xpad_ref[:, y0:y0 + tb + 2 * r, :]          # (cb, tb+2r, Ws)

        # Vertical (sublane) pass first: cheap sublane shifts, and it shrinks
        # the row count before the more expensive lane-axis shifts.
        acc = xp[:, 0:tb, :]
        for dy in range(1, k):
            acc = acc + xp[:, dy:dy + tb, :]             # (cb, tb, Ws)

        # Horizontal (lane) pass on the smaller intermediate.
        out = acc[:, :, 0:w_lane]
        for dx in range(1, k):
            out = out + acc[:, :, dx:dx + w_lane]        # (cb, tb, W_lane)

        # Single fused 1/k^2 scaling, cast, lane-dense store.
        out_ref[0, :, y0:y0 + tb, :] = (out * inv_k2).astype(out_ref.dtype)


# ----------------------------------------------------------------------------
# VMEM-aware channel-block picker (keeps per-step footprint v7x-friendly)
# ----------------------------------------------------------------------------
def _pick_c_block(c, h, w, w_lane, r, th, itemsize, budget_bytes=10 << 20):
    hp, ws = h + 2 * r, w_lane + 2 * r
    per_chan = (hp * ws * 4                      # padded f32 scratch
                + 3 * (th + 2 * r) * ws * 4      # band temporaries (upper bound)
                + 2 * h * w * itemsize           # double-buffered input block
                + 2 * h * w_lane * itemsize)     # double-buffered output block
    cb = max(1, min(c, budget_bytes // max(per_chan, 1)))
    while c % cb != 0:                           # must divide C exactly
        cb -= 1
    return cb


# ----------------------------------------------------------------------------
# Wrapper
# ----------------------------------------------------------------------------
def box_filter(x, r):
    """Separable box filter matching BoxFilter(r).forward.  x: (N, C, H, W)."""
    n, c, h, w = x.shape
    if r == 0:
        return x                                 # kernel_size 1, tap 1.0 => identity

    w_lane = _round_up(w, 128)                   # lane-dense output width
    th = min(h, 128)                             # sublane band height in-kernel
    itemsize = jnp.dtype(x.dtype).itemsize
    cb = _pick_c_block(c, h, w, w_lane, r, th, itemsize)

    hp, ws = h + 2 * r, w_lane + 2 * r
    vmem_needed = (2 * cb * h * w * itemsize          # double-buffered in blocks
                   + 2 * cb * h * w_lane * itemsize   # double-buffered out blocks
                   + cb * hp * ws * 4                 # padded scratch
                   + 3 * cb * (th + 2 * r) * ws * 4)  # band temporaries
    vmem_limit = int(min(max(vmem_needed + (8 << 20), 32 << 20), 48 << 20))

    # TODO(synk): on v6e/v7x the horizontal pass could be a banded-matrix MXU
    # matmul instead of k lane-shifted adds; kept VPU-only for portability.
    out_padded = pl.pallas_call(
        functools.partial(_box_filter_kernel, r=r, h=h, w=w, w_lane=w_lane, th=th),
        grid=(n, c // cb),
        in_specs=[pl.BlockSpec((1, cb, h, w), lambda i, j: (i, j, 0, 0))],
        out_specs=pl.BlockSpec((1, cb, h, w_lane), lambda i, j: (i, j, 0, 0)),
        out_shape=jax.ShapeDtypeStruct((n, c, h, w_lane), x.dtype),
        scratch_shapes=[pltpu.VMEM((cb, hp, ws), jnp.float32)],
        compiler_params=pltpu.CompilerParams(
            dimension_semantics=("parallel", "parallel"),
            vmem_limit_bytes=vmem_limit),
    )(x)

    if w_lane == w:
        return out_padded
    return out_padded[..., :w]


# ----------------------------------------------------------------------------
# Pure-JAX reference (mirrors F.conv2d depthwise semantics) for verification
# ----------------------------------------------------------------------------
def _box_filter_reference(x, r):
    k = 2 * r + 1
    _, _, h, w = x.shape
    xh = jnp.pad(x, ((0, 0), (0, 0), (0, 0), (r, r)))
    xh = sum(xh[..., dx:dx + w] for dx in range(k)) / k
    xv = jnp.pad(xh, ((0, 0), (0, 0), (r, r), (0, 0)))
    xv = sum(xv[..., dy:dy + h, :] for dy in range(k)) / k
    return xv


# ----------------------------------------------------------------------------
if __name__ == "__main__":
    key = jax.random.PRNGKey(0)

    N, C, H, W = 2, 4, 16, 16
    r = 2                                        # kernel_size = 5

    x = jax.random.normal(key, (N, C, H, W), jnp.float32)

    out = box_filter(x, r)
    out = jax.block_until_ready(out)

    assert out.shape == (N, C, H, W), out.shape
    assert bool(jnp.all(jnp.isfinite(out)))

    ref = _box_filter_reference(x, r)
    assert bool(jnp.allclose(out, ref, atol=1e-5, rtol=1e-5)), (
        float(jnp.max(jnp.abs(out - ref))))

    print("KERNEL_OK")
</pallas_src>

<mosaic_0001>
module attributes {stable_mosaic.version = 11 : i64} {
  func.func @_box_filter_kernel(%arg0: i32, %arg1: i32, %arg2: memref<1x4x16x16xf32, #tpu.memory_space<vmem>>, %arg3: memref<1x4x16x128xf32, #tpu.memory_space<vmem>>, %arg4: memref<4x20x132xf32, #tpu.memory_space<vmem>>) attributes {dimension_semantics = [#tpu.dimension_semantics<parallel>, #tpu.dimension_semantics<parallel>], iteration_bounds = array<i64: 2, 1>, scalar_prefetch = 0 : i64, scratch_operands = 1 : i64, tpu.core_type = #tpu.core_type<tc>, window_params = [{transform_indices = @transform_0, window_bounds = array<i64: 1, 4, 16, 16>}, {transform_indices = @transform_1, window_bounds = array<i64: 1, 4, 16, 128>}]} {
    %cst = arith.constant 0.000000e+00 : f32
    %0 = vector.broadcast %cst : f32 to vector<4x20x132xf32>
    %c0 = arith.constant 0 : index
    %c0_0 = arith.constant 0 : index
    %c0_1 = arith.constant 0 : index
    %1 = vector.load %arg4[%c0, %c0_0, %c0_1] : memref<4x20x132xf32, #tpu.memory_space<vmem>>, vector<4x20x132xf32>
    tpu.vector_store %arg4[%c0, %c0_0, %c0_1], %0 {strides = array<i32>} : memref<4x20x132xf32, #tpu.memory_space<vmem>>, vector<4x20x132xf32>,
    %c0_2 = arith.constant 0 : index
    %c0_3 = arith.constant 0 : index
    %c0_4 = arith.constant 0 : index
    %c0_5 = arith.constant 0 : index
    %2 = vector.load %arg2[%c0_2, %c0_3, %c0_4, %c0_5] : memref<1x4x16x16xf32, #tpu.memory_space<vmem>>, vector<1x4x16x16xf32>
    %3 = vector.shape_cast %2 : vector<1x4x16x16xf32> to vector<4x16x16xf32>
    %c0_6 = arith.constant 0 : index
    %c2 = arith.constant 2 : index
    %c2_7 = arith.constant 2 : index
    %4 = vector.load %arg4[%c0_6, %c2, %c2_7] : memref<4x20x132xf32, #tpu.memory_space<vmem>>, vector<4x16x16xf32>
    tpu.vector_store %arg4[%c0_6, %c2, %c2_7], %3 {strides = array<i32>} : memref<4x20x132xf32, #tpu.memory_space<vmem>>, vector<4x16x16xf32>,
    %c0_8 = arith.constant 0 : index
    %c0_9 = arith.constant 0 : index
    %c0_10 = arith.constant 0 : index
    %5 = vector.load %arg4[%c0_8, %c0_9, %c0_10] : memref<4x20x132xf32, #tpu.memory_space<vmem>>, vector<4x20x132xf32>
    %6 = vector.extract_strided_slice %5 {offsets = [0, 0, 0], sizes = [4, 16, 132], strides = [1, 1, 1]} : vector<4x20x132xf32> to vector<4x16x132xf32>
    %7 = vector.extract_strided_slice %5 {offsets = [0, 1, 0], sizes = [4, 16, 132], strides = [1, 1, 1]} : vector<4x20x132xf32> to vector<4x16x132xf32>
    %8 = arith.addf %6, %7 : vector<4x16x132xf32>
    %9 = vector.extract_strided_slice %5 {offsets = [0, 2, 0], sizes = [4, 16, 132], strides = [1, 1, 1]} : vector<4x20x132xf32> to vector<4x16x132xf32>
    %10 = arith.addf %8, %9 : vector<4x16x132xf32>
    %11 = vector.extract_strided_slice %5 {offsets = [0, 3, 0], sizes = [4, 16, 132], strides = [1, 1, 1]} : vector<4x20x132xf32> to vector<4x16x132xf32>
    %12 = arith.addf %10, %11 : vector<4x16x132xf32>
    %13 = vector.extract_strided_slice %5 {offsets = [0, 4, 0], sizes = [4, 16, 132], strides = [1, 1, 1]} : vector<4x20x132xf32> to vector<4x16x132xf32>
    %14 = arith.addf %12, %13 : vector<4x16x132xf32>
    %15 = vector.extract_strided_slice %14 {offsets = [0, 0, 0], sizes = [4, 16, 128], strides = [1, 1, 1]} : vector<4x16x132xf32> to vector<4x16x128xf32>
    %16 = vector.extract_strided_slice %14 {offsets = [0, 0, 1], sizes = [4, 16, 128], strides = [1, 1, 1]} : vector<4x16x132xf32> to vector<4x16x128xf32>
    %17 = arith.addf %15, %16 : vector<4x16x128xf32>
    %18 = vector.extract_strided_slice %14 {offsets = [0, 0, 2], sizes = [4, 16, 128], strides = [1, 1, 1]} : vector<4x16x132xf32> to vector<4x16x128xf32>
    %19 = arith.addf %17, %18 : vector<4x16x128xf32>
    %20 = vector.extract_strided_slice %14 {offsets = [0, 0, 3], sizes = [4, 16, 128], strides = [1, 1, 1]} : vector<4x16x132xf32> to vector<4x16x128xf32>
    %21 = arith.addf %19, %20 : vector<4x16x128xf32>
    %22 = vector.extract_strided_slice %14 {offsets = [0, 0, 4], sizes = [4, 16, 128], strides = [1, 1, 1]} : vector<4x16x132xf32> to vector<4x16x128xf32>
    %23 = arith.addf %21, %22 : vector<4x16x128xf32>
    %cst_11 = arith.constant 4.000000e-02 : f32
    %24 = vector.broadcast %cst_11 : f32 to vector<4x16x128xf32>
    %25 = arith.mulf %23, %24 : vector<4x16x128xf32>
    %c0_12 = arith.constant 0 : index
    %c0_13 = arith.constant 0 : index
    %c0_14 = arith.constant 0 : index
    %c0_15 = arith.constant 0 : index
    %26 = vector.load %arg3[%c0_12, %c0_13, %c0_14, %c0_15] : memref<1x4x16x128xf32, #tpu.memory_space<vmem>>, vector<1x4x16x128xf32>
    %27 = vector.shape_cast %26 : vector<1x4x16x128xf32> to vector<4x16x128xf32>
    %28 = vector.shape_cast %25 : vector<4x16x128xf32> to vector<1x4x16x128xf32>
    tpu.vector_store %arg3[%c0_12, %c0_13, %c0_14, %c0_15], %28 {strides = array<i32>} : memref<1x4x16x128xf32, #tpu.memory_space<vmem>>, vector<1x4x16x128xf32>,
    return
  }
  func.func @transform_0(%arg0: i32, %arg1: i32) -> (i32, i32, i32, i32) {
    %c0_i32 = arith.constant 0 : i32
    %c0_i32_0 = arith.constant 0 : i32
    %c0_i32_1 = arith.constant 0 : i32
    return %arg0, %arg1, %c0_i32, %c0_i32_0 : i32, i32, i32, i32
  }
  func.func @transform_1(%arg0: i32, %arg1: i32) -> (i32, i32, i32, i32) {
    %c0_i32 = arith.constant 0 : i32
    %c0_i32_0 = arith.constant 0 : i32
    %c0_i32_1 = arith.constant 0 : i32
    return %arg0, %arg1, %c0_i32, %c0_i32_0 : i32, i32, i32, i32
  }
}

</mosaic_0001>

<bundles_post_ra>
// kernel: tpu_custom_call.1
= control target key start
LH: loop header
LB: loop body
LE: loop exit
PB: predicated region body
PF: predicated region fallthrough
CT: control target
= control target key end

     0   :  { %6 = vsyncpa [#allocation4], 0  ;;  %s1810_s0 = inlined_call_operand.hbm [shape: f32[2,4,16,16], index: 0, kind: input, shape index: {}]   ;;  %s1811_s1 = inlined_call_operand.hbm [shape: f32[2,4,16,128], index: 1, kind: output, shape index: {}]  }
   0x1   :  { %8 = vsyncpa [#allocation4 + $0x1], 0 }
   0x2   :  { %9 = vsyncpa [#allocation5], 0 }
   0x3   :  { %11 = vsyncpa [#allocation5 + $0x1], 0  ;;  %s1187_s6 = smov 0   ;;  %s1189_s7 = smov 0  }
   0x4   :  { %s1191_s8 = smov 0   ;;  %s1193_s9 = smov 0  }
   0x5   :  { %s1195_s10 = smov 0   ;;  %s1197_s11 = smov 0  }
   0x6 LB: > { %s966_s12 = sadd.s32 4294967295, %s1163_s11   ;;  %s967_s13 = sadd.s32 4294967294, %s1163_s11   ;;  %s1163_s11 = sphi %s1197_s11, %s17_s11   ;;  %s1159_s10 = sphi %s1195_s10, %s1829_s10   ;;  %s1155_s9 = sphi %s1193_s9, %s1828_s9   ;;  %s1151_s8 = sphi %s1191_s8, %s1827_s8   ;;  %s1147_s7 = sphi %s1189_s7, %s1826_s7   ;;  %s1143_s6 = sphi %s1187_s6, %s1825_s6  }
   0x7   : > { %s29_s14 = sadd.s32 1, %s1159_s10  ;;  %s38_s15 = sadd.s32 1, %s1151_s8 }
   0x8   : > { %p31_p0 = scmp.ge.s32.totalorder %s29_s14, 2  ;;  %p45_p1 = scmp.ne.s32.totalorder %s1151_s8, %s1147_s7 }
   0x9   : > { %p46_p2 = scmp.eq.s32.totalorder %s1163_s11, 0  ;;  %p51_p3 = scmp.ne.s32.totalorder %s1147_s7, %s1143_s6 }
   0xa   : > { %s1831_s14 = smov (%p31_p0, %s29_s14), 0  ;;  %p52_p5 = scmp.eq.s32.totalorder %s966_s12, 0 }
   0xb   : > { %p1228_p4 = por %p46_p2, %p45_p1  ;;  %s33_s17 = ssub.s32 %s1159_s10, %s1831_s14 }
   0xc   : > { %p77_p6 = scmp.eq.s32.totalorder %s966_s12, 1  ;;  %p36_p7 = scmp.eq.s32.totalorder %s33_s17, 0 }
   0xd   : > { %p1234_p8 = por %p52_p5, %p51_p3  ;;  %p83_p10 = scmp.eq.s32.totalorder %s967_s13, 1 }
   0xe   : > { %p1238_p9 = por %p77_p6, %p45_p1  ;;  %p995_p13 = scmp.lt.s32.totalorder %s1163_s11, 2 }
   0xf   : > { %s1243_s20 = scalar_select %p36_p7, %s1151_s8, %s38_s15  }
  0x10   : > { %p1245_p11 = por %p83_p10, %p51_p3  ;;  %s103_s22 = sand.u32 1, %s1151_s8  }
  0x11   : > { %s970_s23 = sshll.u32 %s103_s22, 6  ;;  %s981_s24 = sshll.u32 %s1159_s10, 10 }
  0x12   : > { %s116_s27 = scalar_lea.hbm %s1810_s0, %s981_s24  ;;  %s107_s28 = scalar_lea.vmem [#allocation3], %s970_s23 }
  0x13   : > { %s117_s29 = sshll.u32 %s107_s28, 4  ;;  %p1258_p0 = pnand %p995_p13, %p1228_p4  ;;  %s118_s29 = int_to_ptr.vmem [resolvable:$true] %s117_s29 }
  0x14   : > { %p973_p1 = scmp.ge.s32.totalorder %s1163_s11, 1  ;;  %s104_s2 = scalar_lea.sflag [#allocation4], %s103_s22 }
  0x15   : > { %p1057_p2 = pneg %p1258_p0  ;;  %s1068_s3 = scalar_lea.vmem %s118_s29, 1024 }
  0x16   : > { %p1069_p3 = scmp.ne.s32.totalorder %s118_s29, %s1068_s3  ;;  %s1165_s4 = smov [#allocation3]  }
  0x17   : > { %s1073_s5 = sshll.u32 %s1165_s4, 4  ;;  %s1074_s5 = int_to_ptr.vmem [resolvable:$false] %s1073_s5 }
  0x18   : > { %p1071_p5 = pnand %p1069_p3, %p1057_p2  ;;  %s1075_s12 = scalar_lea.vmem %s1074_s5, 2048 }
  0x19   : > { %p1076_p7 = scmp.lt.s32.totalorder %s118_s29, %s1074_s5  ;;  %p1077_p10 = scmp.lt.s32.totalorder %s1075_s12, %s1068_s3 }
  0x1a   : > { %p1072_p6 = pneg %p1071_p5 }
  0x1b   : > { %p1078_p12 = por %p1077_p10, %p1076_p7 }
  0x1d   : > { %p1079_p4 = pnand %p1078_p12, %p1072_p6 }
  0x1f   : > { %1082 = shalt.err (!%p1079_p4)
}
  0x20   : > { %s1166_s13 = smov 128   ;;  %s1167_s15 = smov 8  }
  0x21   : > { %990 = dma.hbm_to_vmem [thread:$0]  (!%p1258_p0), %s116_s27, 1024, %s118_s29, %s104_s2, %s1166_s13, %s1166_s13, %s1167_s15  }
  0x22   : > { %p125_p13 = scmp.lt.s32.totalorder %s1163_s11, 3 }
  0x24   : > { %p126_p2 = pnand %p973_p1, %p125_p13 }
  0x26   : > { %129 = sbr.rel (%p126_p2) target bundleno = 447 (0x1bf), region = 24 }
  0x2b   : > { %s1271_s16 = sand.u32 1, %s1147_s7  }
  0x2c   : > { %s974_s17 = sshll.u32 %s1271_s16, 6  ;;  %s132_s22 = scalar_lea.sflag [#allocation4], %s1271_s16 }
  0x2d   : > { %s1277_s23 = scalar_lea.vmem [#allocation3], %s974_s17 }
  0x2e   : > { %1134 = dma.done.wait (%p1234_p8), %s132_s22, 1024  }
  0x2f   : > { %1136 = vsyncadd (%p1234_p8), %s132_s22, 4294966272  ;;  %v1168_v0 = vmov 0.0   ;;  %vm157_vm0 = vcmask 31744   ;;  %vm162_vm1 = vcmask 27648   ;;  %v183_v1 = vld [vmem:[%s1277_s23 + $0x8] sm:$0xff]  ;;  %v182_v2 = vld [vmem:[%s1277_s23] sm:$0xff] }
  0x30   : > { %161 = vst [vmem:[#allocation2 + $0x20] sm:$0xf] %v1168_v0  ;;  %156 = vst [vmem:[#allocation2] sm:$0xff] %v1168_v0  ;;  %v184_v3 = vld [vmem:[%s1277_s23 + $0x10] sm:$0xff]  ;;  %v200_v4 = vrot.slane %v183_v1, 6  ;;  %v199_v5 = vrot.slane %v182_v2, 6 }
  0x31   : > { %159 = vst [vmem:[#allocation2 + $0x10] sm:$0xff] %v1168_v0  ;;  %164 = vst [vmem:[#allocation2 + $0x30] sm:$0xff] %v1168_v0  ;;  %vm198_vm2 = vcmask 1041408   ;;  %v185_v6 = vld [vmem:[%s1277_s23 + $0x18] sm:$0xff]  ;;  %s1169_s18 = smov 2   ;;  %v202_v8 = vrot.slane %v184_v3, 6 }
  0x32   : > { %166 = vst [vmem:[#allocation2 + $0x40] sm:$0xff] %v1168_v0  ;;  %168 = vst [vmem:[#allocation2 + $0x50] sm:$0xf] %v1168_v0  ;;  %215 = vrot.lane.b32.xlu1 %v200_v4, %s1169_s18  ;;  %211 = vrot.lane.b32.xlu0 %v199_v5, %s1169_s18  ;;  %v186_v9 = vld [vmem:[%s1277_s23 + $0x20] sm:$0xff]  ;;  %vm310_vm3 = vcmask 1046528   ;;  %v201_v11 = vsel %vm198_vm2, %v199_v5, %v200_v4  ;;  %v203_v12 = vrot.slane %v185_v6, 6 }
  0x33   : > { %170 = vst [vmem:[#allocation2 + $0x60] sm:$0xff] %v1168_v0  ;;  %172 = vst [vmem:[#allocation2 + $0x70] sm:$0xff] %v1168_v0  ;;  %v187_v13 = vld [vmem:[%s1277_s23 + $0x28] sm:$0xff]  ;;  %v205_v19 = vrot.slane %v186_v9, 6  ;;  %vm383_vm4 = vcmask 1045504   ;;  %vm456_vm5 = vcmask 1044480  }
  0x34   : > { %174 = vst [vmem:[#allocation2 + $0x80] sm:$0xf] %v1168_v0  ;;  %176 = vst [vmem:[#allocation2 + $0x90] sm:$0xff] %v1168_v0  ;;  %v206_v21 = vrot.slane %v187_v13, 6  ;;  %v204_v25 = vsel %vm198_vm2, %v202_v8, %v203_v12  ;;  %v188_v34 = vld [vmem:[%s1277_s23 + $0x30] sm:$0xff]  ;;  %v189_v35 = vld [vmem:[%s1277_s23 + $0x38] sm:$0xff] }
  0x35   : > { %178 = vst [vmem:[#allocation2 + $0xa0] sm:$0xff] %v1168_v0  ;;  %180 = vst [vmem:[#allocation2 + $0xb0] sm:$0xf] %v1168_v0  ;;  %v208_v46 = vrot.slane %v188_v34, 6  ;;  %v209_v47 = vrot.slane %v189_v35, 6  ;;  %vm529_vm6 = vcmask 1043456  }
  0x36   : > { %158 = vst.msk [vmem:[#allocation2 + $0x8] sm:$0xff] %vm157_vm0, %v1168_v0  ;;  %160 = vst.msk [vmem:[#allocation2 + $0x18] sm:$0xff] %vm157_vm0, %v1168_v0  ;;  %217 = vrot.lane.b32.xlu1 %v202_v8, %s1169_s18  ;;  %213 = vrot.lane.b32.xlu0 %v201_v11, %s1169_s18  ;;  %v207_v30 = vsel %vm198_vm2, %v205_v19, %v206_v21  ;;  %s1170_s24 = smov 127   ;;  %s1171_s25 = smov 126   ;;  %vm251_vm7 = vcmask 140304   ;;  %vm247_vm8 = vcmask 146450  }
  0x37   : > { %165 = vst.msk [vmem:[#allocation2 + $0x38] sm:$0xff] %vm157_vm0, %v1168_v0  ;;  %167 = vst.msk [vmem:[#allocation2 + $0x48] sm:$0xff] %vm157_vm0, %v1168_v0  ;;  %s1172_s26 = smov 125   ;;  %vm249_vm9 = vcmask 146448   ;;  %s1173_s27 = smov 124   ;;  %vm650_vm10 = vcmask 1039360  }
  0x38   : > { %171 = vst.msk [vmem:[#allocation2 + $0x68] sm:$0xff] %vm157_vm0, %v1168_v0  ;;  %173 = vst.msk [vmem:[#allocation2 + $0x78] sm:$0xff] %vm157_vm0, %v1168_v0  ;;  %vm707_vm11 = vcmask 1031168   ;;  %vm764_vm12 = vcmask 1022976   ;;  %vm821_vm13 = vcmask 1014784   ;;  %s1696_s28 = scalar_lea.vmem [#allocation6], %s974_s17 }
  0x39   : > { %177 = vst.msk [vmem:[#allocation2 + $0x98] sm:$0xff] %vm157_vm0, %v1168_v0  ;;  %179 = vst.msk [vmem:[#allocation2 + $0xa8] sm:$0xff] %vm157_vm0, %v1168_v0  ;;  %s879_s29 = sshll.u32 %s1696_s28, 4  ;;  %s982_s30 = sshll.u32 %s1155_s9, 10  ;;  %s1761_s29 = int_to_ptr.vmem [resolvable:$true] %s879_s29 }
  0x3a   : > { %163 = vst.msk [vmem:[#allocation2 + $0x28] sm:$0xf] %vm162_vm1, %v1168_v0  ;;  %169 = vst.msk [vmem:[#allocation2 + $0x58] sm:$0xf] %vm162_vm1, %v1168_v0  ;;  %221 = vrot.lane.b32.xlu1 %v203_v12, %s1169_s18  ;;  %219 = vrot.lane.b32.xlu0 %v204_v25, %s1169_s18  ;;  %s1759_s4 = scalar_lea.hbm %s1811_s1, %s982_s30  ;;  %s863_s5 = scalar_lea.sflag [#allocation5], %s1271_s16 }
  0x3b   : > { %175 = vst.msk [vmem:[#allocation2 + $0x88] sm:$0xf] %vm162_vm1, %v1168_v0  ;;  %181 = vst.msk [vmem:[#allocation2 + $0xb8] sm:$0xf] %vm162_vm1, %v1168_v0  ;;  %v210_v0 = vsel %vm198_vm2, %v208_v46, %v209_v47  ;;  %s1083_s12 = scalar_lea.vmem %s1761_s29, 1024  ;;  %s1174_s9 = smov [#allocation6]  }
  0x3c   : > { %p1084_p8 = scmp.ne.s32.totalorder %s1761_s29, %s1083_s12  ;;  %s1087_s13 = sshll.u32 %s1174_s9, 4  ;;  %s1088_s13 = int_to_ptr.vmem [resolvable:$false] %s1087_s13 }
  0x3d   : > { %v263_v7 = vld [vmem:[#allocation2 + $0x8] sm:$0xff]  ;;  %v1290_v10 = vld [vmem:[#allocation2 + $0x18] sm:$0xff]  ;;  %s1089_s15 = scalar_lea.vmem %s1088_s13, 2048  ;;  %p1090_p1 = scmp.lt.s32.totalorder %s1761_s29, %s1088_s13 }
  0x3e   : > { %v314_v14 = vrot.slane %v263_v7, 1  ;;  %v315_v15 = vrot.slane %v1290_v10, 1  ;;  %v387_v16 = vrot.slane %v263_v7, 2  ;;  %v388_v17 = vrot.slane %v1290_v10, 2  ;;  %v269_v32 = vld [vmem:[#allocation2 + $0x38] sm:$0xff]  ;;  %v1307_v33 = vld [vmem:[#allocation2 + $0x48] sm:$0xff]  ;;  %223 = vrot.lane.b32.xlu0 %v205_v19, %s1169_s18  ;;  %225 = vrot.lane.b32.xlu1 %v207_v30, %s1169_s18  ;;  %p1085_p12 = pnand %p1084_p8, %p1238_p9  ;;  %p1091_p3 = scmp.lt.s32.totalorder %s1089_s15, %s1083_s12 }
  0x3f   : > { %v460_v22 = vrot.slane %v263_v7, 3  ;;  %v461_v23 = vrot.slane %v1290_v10, 3  ;;  %v533_v37 = vrot.slane %v263_v7, 4  ;;  %v324_v39 = vrot.slane %v269_v32, 1  ;;  %v275_v62 = vld [vmem:[#allocation2 + $0x68] sm:$0xff]  ;;  %v1330_v63 = vld [vmem:[#allocation2 + $0x78] sm:$0xff] }
  0x40   : > { %v316_v20 = vsel %vm310_vm3, %v314_v14, %v315_v15  ;;  %v389_v27 = vsel %vm383_vm4, %v387_v16, %v388_v17  ;;  %v534_v40 = vrot.slane %v1290_v10, 4  ;;  %v325_v43 = vrot.slane %v1307_v33, 1  ;;  %p1086_p0 = pneg %p1085_p12  ;;  %p1092_p5 = por %p1091_p3, %p1090_p1 }
  0x41   : > { %v267_v18 = vld [vmem:[#allocation2 + $0x28] sm:$0xf]  ;;  %v368_v26 = vadd.f32 %v316_v20, %v263_v7  ;;  %v462_v31 = vsel %vm456_vm5, %v460_v22, %v461_v23  ;;  %v397_v44 = vrot.slane %v269_v32, 2  ;;  %v398_v45 = vrot.slane %v1307_v33, 2  ;;  %v1319_v49 = vld [vmem:[#allocation2 + $0x58] sm:$0xf] }
  0x42   : > { %v319_v24 = vrot.slane %v267_v18, 1  ;;  %v392_v29 = vrot.slane %v267_v18, 2  ;;  %v465_v42 = vrot.slane %v267_v18, 3  ;;  %v326_v48 = vsel %vm310_vm3, %v324_v39, %v325_v43  ;;  %227 = vrot.lane.b32.xlu0 %v206_v21, %s1169_s18  ;;  %229 = vrot.lane.b32.xlu1 %v208_v46, %s1169_s18  ;;  %v279_v16 = vld [vmem:[#allocation2 + $0x88] sm:$0xf]  ;;  %p1093_p6 = pnand %p1092_p5, %p1086_p0 }
  0x43   : > { %v441_v36 = vadd.f32 %v389_v27, %v368_v26  ;;  %v538_v52 = vrot.slane %v267_v18, 4  ;;  %v535_v53 = vsel %vm529_vm6, %v533_v37, %v534_v40  ;;  %v372_v55 = vadd.f32 %v326_v48, %v269_v32 }
  0x44   : > { %v320_v28 = vsel %vm310_vm3, %v315_v15, %v319_v24  ;;  %v393_v41 = vsel %vm383_vm4, %v388_v17, %v392_v29  ;;  %v466_v54 = vsel %vm456_vm5, %v461_v23, %v465_v42  ;;  %v329_v56 = vrot.slane %v1319_v49, 1  ;;  %v283_v29 = vld [vmem:[#allocation2 + $0xa8] sm:$0xff] }
  0x45   : > { %v370_v38 = vadd.f32 %v320_v28, %v1290_v10  ;;  %v514_v50 = vadd.f32 %v462_v31, %v441_v36  ;;  %v399_v57 = vsel %vm383_vm4, %v397_v44, %v398_v45  ;;  %v470_v58 = vrot.slane %v269_v32, 3  ;;  %v281_v28 = vld [vmem:[#allocation2 + $0x98] sm:$0xff] }
  0x46   : > { %v471_v59 = vrot.slane %v1307_v33, 3  ;;  %v402_v60 = vrot.slane %v1319_v49, 2  ;;  %v330_v61 = vsel %vm310_vm3, %v325_v43, %v329_v56  ;;  %v539_v3 = vsel %vm529_vm6, %v534_v40, %v538_v52  ;;  %233 = vrot.lane.b32.xlu1 %v209_v47, %s1169_s18  ;;  %231 = vrot.lane.b32.xlu0 %v210_v0, %s1169_s18  ;;  %v285_v43 = vld [vmem:[#allocation2 + $0xb8] sm:$0xf] }
  0x47   : > { %v443_v51 = vadd.f32 %v393_v41, %v370_v38  ;;  %v1333_v1 = vadd.f32 %v535_v53, %v514_v50  ;;  %v445_v4 = vadd.f32 %v399_v57, %v372_v55  ;;  %v543_v5 = vrot.slane %v269_v32, 4 }
  0x48   : > { %v334_v6 = vrot.slane %v275_v62, 1  ;;  %v335_v7 = vrot.slane %v1330_v63, 1  ;;  %v472_v8 = vsel %vm456_vm5, %v470_v58, %v471_v59  ;;  %v544_v9 = vrot.slane %v1307_v33, 4 }
  0x49   : > { %v516_v2 = vadd.f32 %v466_v54, %v443_v51  ;;  %v374_v10 = vadd.f32 %v330_v61, %v1307_v33  ;;  %v403_v11 = vsel %vm383_vm4, %v398_v45, %v402_v60  ;;  %v475_v12 = vrot.slane %v1319_v49, 3 }
  0x4a   : > { %v336_v13 = vsel %vm310_vm3, %v334_v6, %v335_v7  ;;  %v407_v14 = vrot.slane %v275_v62, 2  ;;  %v408_v15 = vrot.slane %v1330_v63, 2  ;;  %v518_v18 = vadd.f32 %v472_v8, %v445_v4  ;;  %620 = vrot.lane.b32.xlu1 %v1333_v1, %s1170_s24 }
  0x4b   : > { %v1346_v17 = vadd.f32 %v539_v3, %v516_v2  ;;  %v339_v19 = vrot.slane %v279_v16, 1  ;;  %v545_v20 = vsel %vm529_vm6, %v543_v5, %v544_v9  ;;  %v447_v21 = vadd.f32 %v403_v11, %v374_v10 }
  0x4c   : > { %v548_v22 = vrot.slane %v1319_v49, 4  ;;  %v376_v23 = vadd.f32 %v336_v13, %v275_v62  ;;  %v476_v24 = vsel %vm456_vm5, %v471_v59, %v475_v12  ;;  %v409_v25 = vsel %vm383_vm4, %v407_v14, %v408_v15 }
  0x4d   : > { %v480_v26 = vrot.slane %v275_v62, 3  ;;  %v481_v27 = vrot.slane %v1330_v63, 3  ;;  %v340_v30 = vsel %vm310_vm3, %v335_v7, %v339_v19  ;;  %v412_v31 = vrot.slane %v279_v16, 2 }
  0x4e   : > { %v1356_v32 = vadd.f32 %v545_v20, %v518_v18  ;;  %v344_v33 = vrot.slane %v281_v28, 1  ;;  %v345_v34 = vrot.slane %v283_v29, 1  ;;  %v520_v35 = vadd.f32 %v476_v24, %v447_v21  ;;  %624 = vrot.lane.b32.xlu1 %v1346_v17, %s1170_s24 }
  0x4f   : > { %v449_v36 = vadd.f32 %v409_v25, %v376_v23  ;;  %v553_v37 = vrot.slane %v275_v62, 4  ;;  %v554_v38 = vrot.slane %v1330_v63, 4  ;;  %v549_v39 = vsel %vm529_vm6, %v544_v9, %v548_v22 }
  0x50   : > { %v482_v40 = vsel %vm456_vm5, %v480_v26, %v481_v27  ;;  %v378_v41 = vadd.f32 %v340_v30, %v1330_v63  ;;  %v485_v42 = vrot.slane %v279_v16, 3  ;;  %v413_v44 = vsel %vm383_vm4, %v408_v15, %v412_v31 }
  0x51   : > { %v346_v45 = vsel %vm310_vm3, %v344_v33, %v345_v34  ;;  %v417_v46 = vrot.slane %v281_v28, 2  ;;  %v418_v47 = vrot.slane %v283_v29, 2  ;;  %v349_v48 = vrot.slane %v285_v43, 1 }
  0x52   : > { %v1366_v49 = vadd.f32 %v549_v39, %v520_v35  ;;  %v522_v50 = vadd.f32 %v482_v40, %v449_v36  ;;  %v555_v51 = vsel %vm529_vm6, %v553_v37, %v554_v38  ;;  %v558_v52 = vrot.slane %v279_v16, 4  ;;  %628 = vrot.lane.b32.xlu1 %v1356_v32, %s1170_s24 }
  0x53   : > { %v451_v53 = vadd.f32 %v413_v44, %v378_v41  ;;  %v486_v54 = vsel %vm456_vm5, %v481_v27, %v485_v42  ;;  %v380_v55 = vadd.f32 %v346_v45, %v281_v28  ;;  %v490_v56 = vrot.slane %v281_v28, 3 }
  0x54   : > { %v419_v57 = vsel %vm383_vm4, %v417_v46, %v418_v47  ;;  %v491_v58 = vrot.slane %v283_v29, 3  ;;  %v350_v59 = vsel %vm310_vm3, %v345_v34, %v349_v48  ;;  %v422_v60 = vrot.slane %v285_v43, 2 }
  0x55   : > { %v1374_v61 = vadd.f32 %v555_v51, %v522_v50  ;;  %v559_v62 = vsel %vm529_vm6, %v554_v38, %v558_v52  ;;  %v524_v63 = vadd.f32 %v486_v54, %v451_v53  ;;  %v453_v0 = vadd.f32 %v419_v57, %v380_v55 }
  0x56   : > { %632 = vrot.lane.b32.xlu1 %v1366_v49, %s1170_s24  ;;  %v563_v2 = vrot.slane %v281_v28, 4  ;;  %v382_v3 = vadd.f32 %v350_v59, %v283_v29  ;;  %v492_v4 = vsel %vm456_vm5, %v490_v56, %v491_v58  ;;  %v564_v5 = vrot.slane %v283_v29, 4 }
  0x57   : > { %v423_v6 = vsel %vm383_vm4, %v418_v47, %v422_v60  ;;  %v495_v7 = vrot.slane %v285_v43, 3  ;;  %v1383_v8 = vadd.f32 %v559_v62, %v524_v63  ;;  %v526_v9 = vadd.f32 %v492_v4, %v453_v0 }
  0x58   : > { %v455_v10 = vadd.f32 %v423_v6, %v382_v3  ;;  %v565_v11 = vsel %vm529_vm6, %v563_v2, %v564_v5  ;;  %v568_v13 = vrot.slane %v285_v43, 4 }
  0x59   : > { %v496_v12 = vsel %vm456_vm5, %v491_v58, %v495_v7  ;;  %v1389_v14 = vadd.f32 %v565_v11, %v526_v9 }
  0x5a   : > { %636 = vrot.lane.b32.xlu1 %v1374_v61, %s1170_s24  ;;  %v528_v15 = vadd.f32 %v496_v12, %v455_v10  ;;  %v569_v16 = vsel %vm529_vm6, %v564_v5, %v568_v13 }
  0x5c   : > { %v1394_v18 = vadd.f32 %v569_v16, %v528_v15 }
  0x5e   : > { %640 = vrot.lane.b32.xlu1 %v1383_v8, %s1170_s24 }
  0x62   : > { %644 = vrot.lane.b32.xlu1 %v1389_v14, %s1170_s24 }
  0x66   : > { %648 = vrot.lane.b32.xlu1 %v1394_v18, %s1170_s24 }
  0x6a   : > { %677 = vrot.lane.b32.xlu1 %v1333_v1, %s1171_s25 }
  0x6e   : > { %681 = vrot.lane.b32.xlu1 %v1346_v17, %s1171_s25 }
  0x72   : > { %685 = vrot.lane.b32.xlu1 %v1356_v32, %s1171_s25 }
  0x76   : > { %689 = vrot.lane.b32.xlu1 %v1366_v49, %s1171_s25 }
  0x7a   : > { %693 = vrot.lane.b32.xlu1 %v1374_v61, %s1171_s25 }
  0x7e   : > { %697 = vrot.lane.b32.xlu1 %v1383_v8, %s1171_s25 }
  0x82   : > { %701 = vrot.lane.b32.xlu1 %v1389_v14, %s1171_s25 }
  0x86   : > { %705 = vrot.lane.b32.xlu1 %v1394_v18, %s1171_s25 }
  0x8a   : > { %734 = vrot.lane.b32.xlu1 %v1333_v1, %s1172_s26 }
  0x8e   : > { %738 = vrot.lane.b32.xlu1 %v1346_v17, %s1172_s26 }
  0x92   : > { %742 = vrot.lane.b32.xlu1 %v1356_v32, %s1172_s26 }
  0x96   : > { %746 = vrot.lane.b32.xlu1 %v1366_v49, %s1172_s26 }
  0x9a   : > { %750 = vrot.lane.b32.xlu1 %v1374_v61, %s1172_s26 }
  0x9e   : > { %754 = vrot.lane.b32.xlu1 %v1383_v8, %s1172_s26 }
  0xa2   : > { %758 = vrot.lane.b32.xlu1 %v1389_v14, %s1172_s26 }
  0xa4   : > { %v216_v19 = vpop.permute.xlu1 %215  ;;  %v212_v20 = vpop.permute.xlu0 %211 }
  0xa5   : > { %252 = vst.msk [vmem:[#allocation2 + $0x20] sm:$0x3] %vm251_vm7, %v216_v19 }
  0xa6   : > { %248 = vst.msk [vmem:[#allocation2] sm:$0xfc] %vm247_vm8, %v212_v20  ;;  %762 = vrot.lane.b32.xlu1 %v1394_v18, %s1172_s26 }
  0xa8   : > { %v218_v21 = vpop.permute.xlu1 %217  ;;  %v214_v22 = vpop.permute.xlu0 %213 }
  0xa9   : > { %253 = vst.msk [vmem:[#allocation2 + $0x30] sm:$0xfc] %vm247_vm8, %v218_v21 }
  0xaa   : > { %250 = vst.msk [vmem:[#allocation2 + $0x10] sm:$0xff] %vm249_vm9, %v214_v22  ;;  %791 = vrot.lane.b32.xlu1 %v1333_v1, %s1173_s27 }
  0xac   : > { %v222_v23 = vpop.permute.xlu1 %221  ;;  %v220_v24 = vpop.permute.xlu0 %219  ;;  %v1438_v26 = vld [vmem:[#allocation2 + $0x20] sm:$0xf] }
  0xad   : > { %255 = vst.msk [vmem:[#allocation2 + $0x50] sm:$0x3] %vm251_vm7, %v222_v23  ;;  %v262_v25 = vld [vmem:[#allocation2] sm:$0xff]  ;;  %v317_v1 = vrot.slane %v1438_v26, 1  ;;  %v390_v38 = vrot.slane %v1438_v26, 2  ;;  %v463_v39 = vrot.slane %v1438_v26, 3 }
  0xae   : > { %254 = vst.msk [vmem:[#allocation2 + $0x40] sm:$0xff] %vm249_vm9, %v220_v24  ;;  %795 = vrot.lane.b32.xlu1 %v1346_v17, %s1173_s27  ;;  %v311_v30 = vrot.slane %v262_v25, 1  ;;  %v384_v31 = vrot.slane %v262_v25, 2  ;;  %v457_v36 = vrot.slane %v262_v25, 3  ;;  %v530_v37 = vrot.slane %v262_v25, 4 }
  0xaf   : > { %v536_v40 = vrot.slane %v1438_v26, 4 }
  0xb0   : > { %v224_v27 = vpop.permute.xlu0 %223  ;;  %v226_v28 = vpop.permute.xlu1 %225  ;;  %v1445_v33 = vld [vmem:[#allocation2 + $0x30] sm:$0xff] }
  0xb1   : > { %v1442_v29 = vld [vmem:[#allocation2 + $0x10] sm:$0xff]  ;;  %256 = vst.msk [vmem:[#allocation2 + $0x60] sm:$0xfc] %vm247_vm8, %v224_v27  ;;  %v321_v43 = vrot.slane %v1445_v33, 1  ;;  %v394_v44 = vrot.slane %v1445_v33, 2  ;;  %v467_v52 = vrot.slane %v1445_v33, 3 }
  0xb2   : > { %257 = vst.msk [vmem:[#allocation2 + $0x70] sm:$0xff] %vm249_vm9, %v226_v28  ;;  %v312_v34 = vrot.slane %v1442_v29, 1  ;;  %v385_v35 = vrot.slane %v1442_v29, 2  ;;  %v458_v17 = vrot.slane %v1442_v29, 3  ;;  %799 = vrot.lane.b32.xlu1 %v1356_v32, %s1173_s27  ;;  %v531_v42 = vrot.slane %v1442_v29, 4 }
  0xb3   : > { %v540_v20 = vrot.slane %v1445_v33, 4 }
  0xb4   : > { %v313_v41 = vsel %vm310_vm3, %v311_v30, %v312_v34  ;;  %v228_v45 = vpop.permute.xlu0 %227  ;;  %v230_v46 = vpop.permute.xlu1 %229  ;;  %v386_v48 = vsel %vm383_vm4, %v384_v31, %v385_v35  ;;  %v318_v50 = vsel %vm310_vm3, %v312_v34, %v317_v1  ;;  %v1466_v32 = vld [vmem:[#allocation2 + $0x50] sm:$0xf]  ;;  %v459_v53 = vsel %vm456_vm5, %v457_v36, %v458_v17 }
  0xb5   : > { %v367_v47 = vadd.f32 %v313_v41, %v262_v25  ;;  %v1463_v51 = vld [vmem:[#allocation2 + $0x40] sm:$0xff]  ;;  %258 = vst.msk [vmem:[#allocation2 + $0x80] sm:$0x3] %vm251_vm7, %v228_v45  ;;  %v369_v54 = vadd.f32 %v318_v50, %v1442_v29  ;;  %v391_v58 = vsel %vm383_vm4, %v385_v35, %v390_v38  ;;  %v327_v60 = vrot.slane %v1466_v32, 1 }
  0xb6   : > { %259 = vst.msk [vmem:[#allocation2 + $0x90] sm:$0xfc] %vm247_vm8, %v230_v46  ;;  %v322_v55 = vrot.slane %v1463_v51, 1  ;;  %v395_v56 = vrot.slane %v1463_v51, 2  ;;  %v468_v59 = vrot.slane %v1463_v51, 3  ;;  %803 = vrot.lane.b32.xlu1 %v1366_v49, %s1173_s27  ;;  %v400_v2 = vrot.slane %v1466_v32, 2 }
  0xb7   : > { %v440_v57 = vadd.f32 %v386_v48, %v367_v47  ;;  %v442_v62 = vadd.f32 %v391_v58, %v369_v54  ;;  %v532_v6 = vsel %vm529_vm6, %v530_v37, %v531_v42  ;;  %v464_v7 = vsel %vm456_vm5, %v458_v17, %v463_v39 }
  0xb8   : > { %v323_v63 = vsel %vm310_vm3, %v321_v43, %v322_v55  ;;  %v396_v0 = vsel %vm383_vm4, %v394_v44, %v395_v56  ;;  %v234_v3 = vpop.permute.xlu1 %233  ;;  %v232_v4 = vpop.permute.xlu0 %231  ;;  %v274_v10 = vld [vmem:[#allocation2 + $0x60] sm:$0xff]  ;;  %v328_v12 = vsel %vm310_vm3, %v322_v55, %v327_v60  ;;  %v401_v13 = vsel %vm383_vm4, %v395_v56, %v400_v2 }
  0xb9   : > { %v513_v5 = vadd.f32 %v459_v53, %v440_v57  ;;  %v371_v9 = vadd.f32 %v323_v63, %v1445_v33  ;;  %v1485_v11 = vld [vmem:[#allocation2 + $0x70] sm:$0xff]  ;;  %261 = vst.msk [vmem:[#allocation2 + $0xb0] sm:$0x3] %vm251_vm7, %v234_v3  ;;  %v515_v49 = vadd.f32 %v464_v7, %v442_v62  ;;  %v473_v15 = vrot.slane %v1466_v32, 3 }
  0xba   : > { %260 = vst.msk [vmem:[#allocation2 + $0xa0] sm:$0xff] %vm249_vm9, %v232_v4  ;;  %v373_v21 = vadd.f32 %v328_v12, %v1463_v51  ;;  %807 = vrot.lane.b32.xlu1 %v1374_v61, %s1173_s27  ;;  %v469_v22 = vsel %vm456_vm5, %v467_v52, %v468_v59  ;;  %v541_v23 = vrot.slane %v1463_v51, 4  ;;  %v331_v24 = vrot.slane %v274_v10, 1 }
  0xbb   : > { %v1492_v16 = vadd.f32 %v532_v6, %v513_v5  ;;  %v444_v19 = vadd.f32 %v396_v0, %v371_v9  ;;  %v332_v25 = vrot.slane %v1485_v11, 1  ;;  %v537_v26 = vsel %vm529_vm6, %v531_v42, %v536_v40 }
  0xbc   : > { %v446_v27 = vadd.f32 %v401_v13, %v373_v21  ;;  %v404_v28 = vrot.slane %v274_v10, 2  ;;  %v1504_v29 = vld [vmem:[#allocation2 + $0x80] sm:$0xf]  ;;  %v1506_v30 = vadd.f32 %v537_v26, %v515_v49  ;;  %v474_v61 = vsel %vm456_vm5, %v468_v59, %v473_v15 }
  0xbd   : > { %618 = vrot.lane.b32.xlu0 %v1492_v16, %s1170_s24  ;;  %v333_v31 = vsel %vm310_vm3, %v331_v24, %v332_v25  ;;  %v405_v1 = vrot.slane %v1485_v11, 2  ;;  %v517_v33 = vadd.f32 %v469_v22, %v444_v19  ;;  %v477_v35 = vrot.slane %v274_v10, 3  ;;  %v280_v17 = vld [vmem:[#allocation2 + $0x90] sm:$0xff] }
  0xbe   : > { %v375_v34 = vadd.f32 %v333_v31, %v274_v10  ;;  %v478_v36 = vrot.slane %v1485_v11, 3  ;;  %811 = vrot.lane.b32.xlu1 %v1383_v8, %s1173_s27  ;;  %v542_v37 = vsel %vm529_vm6, %v540_v20, %v541_v23  ;;  %v337_v39 = vrot.slane %v1504_v29, 1 }
  0xbf   : > { %v406_v38 = vsel %vm383_vm4, %v404_v28, %v405_v1  ;;  %v519_v40 = vadd.f32 %v474_v61, %v446_v27  ;;  %v546_v41 = vrot.slane %v1466_v32, 4  ;;  %v550_v42 = vrot.slane %v274_v10, 4 }
  0xc0   : > { %v410_v43 = vrot.slane %v1504_v29, 2  ;;  %v448_v45 = vadd.f32 %v406_v38, %v375_v34  ;;  %v551_v46 = vrot.slane %v1485_v11, 4  ;;  %v338_v8 = vsel %vm310_vm3, %v332_v25, %v337_v39  ;;  %v284_v56 = vld [vmem:[#allocation2 + $0xb0] sm:$0xf] }
  0xc1   : > { %622 = vrot.lane.b32.xlu0 %v1506_v30, %s1170_s24  ;;  %v282_v44 = vld [vmem:[#allocation2 + $0xa0] sm:$0xff]  ;;  %v341_v47 = vrot.slane %v280_v17, 1  ;;  %v1523_v48 = vadd.f32 %v542_v37, %v517_v33  ;;  %v479_v50 = vsel %vm456_vm5, %v477_v35, %v478_v36  ;;  %v377_v51 = vadd.f32 %v338_v8, %v1485_v11 }
  0xc2   : > { %v483_v52 = vrot.slane %v1504_v29, 3  ;;  %815 = vrot.lane.b32.xlu1 %v1389_v14, %s1173_s27  ;;  %v411_v32 = vsel %vm383_vm4, %v405_v1, %v410_v43  ;;  %v342_v53 = vrot.slane %v282_v44, 1  ;;  %v414_v54 = vrot.slane %v280_v17, 2  ;;  %v1578_v1 = vpop.permute.xlu1 %620 }
  0xc3   : > { %v415_v55 = vrot.slane %v282_v44, 2  ;;  %v547_v57 = vsel %vm529_vm6, %v541_v23, %v546_v41  ;;  %v521_v59 = vadd.f32 %v479_v50, %v448_v45  ;;  %v552_v60 = vsel %vm529_vm6, %v550_v42, %v551_v46 }
  0xc4   : > { %v1534_v58 = vadd.f32 %v547_v57, %v519_v40  ;;  %v343_v62 = vsel %vm310_vm3, %v341_v47, %v342_v53  ;;  %v450_v63 = vadd.f32 %v411_v32, %v377_v51  ;;  %v484_v14 = vsel %vm456_vm5, %v478_v36, %v483_v52 }
  0xc5   : > { %626 = vrot.lane.b32.xlu0 %v1523_v48, %s1170_s24  ;;  %v379_v0 = vadd.f32 %v343_v62, %v280_v17  ;;  %v347_v2 = vrot.slane %v284_v56, 1  ;;  %v416_v3 = vsel %vm383_vm4, %v414_v54, %v415_v55  ;;  %v487_v4 = vrot.slane %v280_v17, 3 }
  0xc6   : > { %819 = vrot.lane.b32.xlu1 %v1394_v18, %s1173_s27  ;;  %v488_v5 = vrot.slane %v282_v44, 3  ;;  %v420_v6 = vrot.slane %v284_v56, 2  ;;  %v1545_v9 = vadd.f32 %v552_v60, %v521_v59  ;;  %v556_v10 = vrot.slane %v1504_v29, 4  ;;  %v1584_v33 = vpop.permute.xlu1 %624 }
  0xc7   : > { %v348_v7 = vsel %vm310_vm3, %v342_v53, %v347_v2  ;;  %v523_v11 = vadd.f32 %v484_v14, %v450_v63  ;;  %v452_v49 = vadd.f32 %v416_v3, %v379_v0  ;;  %v560_v12 = vrot.slane %v280_v17, 4 }
  0xc8   : > { %v381_v13 = vadd.f32 %v348_v7, %v282_v44  ;;  %v489_v18 = vsel %vm456_vm5, %v487_v4, %v488_v5  ;;  %v561_v15 = vrot.slane %v282_v44, 4  ;;  %v421_v19 = vsel %vm383_vm4, %v415_v55, %v420_v6 }
  0xc9   : > { %630 = vrot.lane.b32.xlu0 %v1534_v58, %s1170_s24  ;;  %v493_v20 = vrot.slane %v284_v56, 3  ;;  %v557_v21 = vsel %vm529_vm6, %v551_v46, %v556_v10  ;;  %v525_v23 = vadd.f32 %v489_v18, %v452_v49  ;;  %v566_v27 = vrot.slane %v284_v56, 4 }
  0xca   : > { %v1553_v22 = vadd.f32 %v557_v21, %v523_v11  ;;  %v454_v24 = vadd.f32 %v421_v19, %v381_v13  ;;  %v562_v25 = vsel %vm529_vm6, %v560_v12, %v561_v15  ;;  %v1588_v34 = vpop.permute.xlu1 %628 }
  0xcb   : > { %v494_v26 = vsel %vm456_vm5, %v488_v5, %v493_v20  ;;  %v1559_v28 = vadd.f32 %v562_v25, %v525_v23  ;;  %v567_v61 = vsel %vm529_vm6, %v561_v15, %v566_v27 }
  0xcc   : > { %v527_v29 = vadd.f32 %v494_v26, %v454_v24 }
  0xcd   : > { %634 = vrot.lane.b32.xlu0 %v1545_v9, %s1170_s24 }
  0xce   : > { %v1564_v31 = vadd.f32 %v567_v61, %v527_v29  ;;  %v1594_v35 = vpop.permute.xlu1 %632 }
  0xd0   : > { %1818 = vst [vmem:[#allocation9_spill] sm:$0xff] %v1564_v31 }
  0xd1   : > { %638 = vrot.lane.b32.xlu0 %v1553_v22, %s1170_s24 }
  0xd2   : > { %v1598_v36 = vpop.permute.xlu1 %636 }
  0xd5   : > { %642 = vrot.lane.b32.xlu0 %v1559_v28, %s1170_s24 }
  0xd6   : > { %v1604_v17 = vpop.permute.xlu1 %640 }
  0xd9   : > { %646 = vrot.lane.b32.xlu0 %v1564_v31, %s1170_s24 }
  0xda   : > { %v1608_v37 = vpop.permute.xlu1 %644 }
  0xdd   : > { %675 = vrot.lane.b32.xlu0 %v1492_v16, %s1171_s25 }
  0xde   : > { %v1614_v38 = vpop.permute.xlu1 %648 }
  0xe1   : > { %679 = vrot.lane.b32.xlu0 %v1506_v30, %s1171_s25 }
  0xe2   : > { %v678_v39 = vpop.permute.xlu1 %677 }
  0xe5   : > { %683 = vrot.lane.b32.xlu0 %v1523_v48, %s1171_s25 }
  0xe6   : > { %v682_v40 = vpop.permute.xlu1 %681 }
  0xe9   : > { %687 = vrot.lane.b32.xlu0 %v1534_v58, %s1171_s25 }
  0xea   : > { %v1624_v41 = vpop.permute.xlu1 %685 }
  0xed   : > { %691 = vrot.lane.b32.xlu0 %v1545_v9, %s1171_s25 }
  0xee   : > { %v1630_v43 = vpop.permute.xlu1 %689 }
  0xf1   : > { %695 = vrot.lane.b32.xlu0 %v1553_v22, %s1171_s25 }
  0xf2   : > { %v1634_v46 = vpop.permute.xlu1 %693 }
  0xf5   : > { %699 = vrot.lane.b32.xlu0 %v1559_v28, %s1171_s25 }
  0xf6   : > { %v1638_v47 = vpop.permute.xlu1 %697 }
  0xf9   : > { %703 = vrot.lane.b32.xlu0 %v1564_v31, %s1171_s25 }
  0xfa   : > { %v1644_v52 = vpop.permute.xlu1 %701 }
  0xfd   : > { %732 = vrot.lane.b32.xlu0 %v1492_v16, %s1172_s26 }
  0xfe   : > { %v1648_v53 = vpop.permute.xlu1 %705 }
 0x101   : > { %736 = vrot.lane.b32.xlu0 %v1506_v30, %s1172_s26 }
 0x102   : > { %v735_v56 = vpop.permute.xlu1 %734 }
 0x105   : > { %740 = vrot.lane.b32.xlu0 %v1523_v48, %s1172_s26 }
 0x106   : > { %v739_v59 = vpop.permute.xlu1 %738 }
 0x109   : > { %744 = vrot.lane.b32.xlu0 %v1534_v58, %s1172_s26 }
 0x10a   : > { %v743_v63 = vpop.permute.xlu1 %742 }
 0x10d   : > { %748 = vrot.lane.b32.xlu0 %v1545_v9, %s1172_s26 }
 0x10e   : > { %v747_v0 = vpop.permute.xlu1 %746 }
 0x111   : > { %752 = vrot.lane.b32.xlu0 %v1553_v22, %s1172_s26 }
 0x112   : > { %v1658_v4 = vpop.permute.xlu1 %750 }
 0x115   : > { %756 = vrot.lane.b32.xlu0 %v1559_v28, %s1172_s26 }
 0x116   : > { %v1662_v6 = vpop.permute.xlu1 %754 }
 0x119   : > { %760 = vrot.lane.b32.xlu0 %v1564_v31, %s1172_s26 }
 0x11a   : > { %v1664_v11 = vpop.permute.xlu1 %758 }
 0x11d   : > { %789 = vrot.lane.b32.xlu0 %v1492_v16, %s1173_s27 }
 0x11e   : > { %v1666_v12 = vpop.permute.xlu1 %762 }
 0x11f   : > { %1820 = vst [vmem:[#allocation11_spill] sm:$0xff] %v1666_v12 }
 0x121   : > { %793 = vrot.lane.b32.xlu0 %v1506_v30, %s1173_s27 }
 0x122   : > { %v792_v15 = vpop.permute.xlu1 %791 }
 0x125   : > { %797 = vrot.lane.b32.xlu0 %v1523_v48, %s1173_s27 }
 0x126   : > { %v796_v20 = vpop.permute.xlu1 %795 }
 0x129   : > { %801 = vrot.lane.b32.xlu0 %v1534_v58, %s1173_s27 }
 0x12a   : > { %v800_v27 = vpop.permute.xlu1 %799 }
 0x12d   : > { %805 = vrot.lane.b32.xlu0 %v1545_v9, %s1173_s27 }
 0x12f   : > { %v619_v42 = vpop.permute.xlu0 %618 }
 0x130   : > { %v651_v23 = vsel %vm650_vm10, %v619_v42, %v1578_v1 }
 0x131   : > { %809 = vrot.lane.b32.xlu0 %v1553_v22, %s1173_s27  ;;  %v667_v25 = vadd.f32 %v651_v23, %v1492_v16 }
 0x133   : > { %v623_v44 = vpop.permute.xlu0 %622 }
 0x134   : > { %v652_v29 = vsel %vm650_vm10, %v623_v44, %v1584_v33  ;;  %v804_v44 = vpop.permute.xlu1 %803 }
 0x135   : > { %813 = vrot.lane.b32.xlu0 %v1559_v28, %s1173_s27 }
 0x137   : > { %v627_v45 = vpop.permute.xlu0 %626 }
 0x138   : > { %v653_v16 = vsel %vm650_vm10, %v627_v45, %v1588_v34 }
 0x139   : > { %817 = vrot.lane.b32.xlu0 %v1564_v31, %s1173_s27 }
 0x13b   : > { %v631_v8 = vpop.permute.xlu0 %630 }
 0x13f   : > { %v1640_v50 = vpop.permute.xlu0 %634 }
 0x143   : > { %v1642_v51 = vpop.permute.xlu0 %638 }
 0x147   : > { %v1646_v32 = vpop.permute.xlu0 %642 }
 0x14b   : > { %v1650_v54 = vpop.permute.xlu0 %646 }
 0x14f   : > { %v676_v55 = vpop.permute.xlu0 %675 }
 0x150   : > { %v708_v24 = vsel %vm707_vm11, %v676_v55, %v678_v39 }
 0x151   : > { %v724_v12 = vadd.f32 %v708_v24, %v667_v25 }
 0x153   : > { %v680_v57 = vpop.permute.xlu0 %679 }
 0x154   : > { %v709_v31 = vsel %vm707_vm11, %v680_v57, %v682_v40  ;;  %v669_v40 = vadd.f32 %v653_v16, %v1523_v48 }
 0x157   : > { %v684_v60 = vpop.permute.xlu0 %683 }
 0x15b   : > { %v688_v62 = vpop.permute.xlu0 %687 }
 0x15c   : > { %v711_v48 = vsel %vm707_vm11, %v688_v62, %v1630_v43 }
 0x15f   : > { %v1652_v14 = vpop.permute.xlu0 %691 }
 0x163   : > { %v1654_v2 = vpop.permute.xlu0 %695 }
 0x167   : > { %v1656_v3 = vpop.permute.xlu0 %699 }
 0x16b   : > { %v1660_v5 = vpop.permute.xlu0 %703 }
 0x16c   : > { %1819 = vst [vmem:[#allocation10_spill] sm:$0xff] %v1660_v5  ;;  %v668_v5 = vadd.f32 %v652_v29, %v1506_v30 }
 0x16e   : > { %v725_v23 = vadd.f32 %v709_v31, %v668_v5 }
 0x16f   : > { %v733_v7 = vpop.permute.xlu0 %732 }
 0x170   : > { %v765_v61 = vsel %vm764_vm12, %v733_v7, %v735_v56  ;;  %v710_v56 = vsel %vm707_vm11, %v684_v60, %v1624_v41 }
 0x171   : > { %v781_v1 = vadd.f32 %v765_v61, %v724_v12  ;;  %v654_v12 = vsel %vm650_vm10, %v631_v8, %v1594_v35  ;;  %v808_v8 = vpop.permute.xlu1 %807 }
 0x172   : > { %v670_v41 = vadd.f32 %v654_v12, %v1534_v58  ;;  %v712_v58 = vsel %vm707_vm11, %v1652_v14, %v1634_v46 }
 0x173   : > { %v737_v10 = vpop.permute.xlu0 %736 }
 0x174   : > { %v766_v39 = vsel %vm764_vm12, %v737_v10, %v739_v59  ;;  %v726_v59 = vadd.f32 %v710_v56, %v669_v40  ;;  %v1823_v56 = vld [vmem:[#allocation11_spill] sm:$0xff] }
 0x175   : > { %v782_v57 = vadd.f32 %v766_v39, %v725_v23  ;;  %v812_v29 = vpop.permute.xlu1 %811  ;;  %v1822_v23 = vld [vmem:[#allocation9_spill] sm:$0xff] }
 0x177   : > { %v741_v49 = vpop.permute.xlu0 %740 }
 0x178   : > { %v767_v34 = vsel %vm764_vm12, %v741_v49, %v743_v63  ;;  %v655_v63 = vsel %vm650_vm10, %v1640_v50, %v1598_v36  ;;  %v656_v36 = vsel %vm650_vm10, %v1642_v51, %v1604_v17  ;;  %v657_v17 = vsel %vm650_vm10, %v1646_v32, %v1608_v37 }
 0x179   : > { %v783_v60 = vadd.f32 %v767_v34, %v726_v59  ;;  %v671_v43 = vadd.f32 %v655_v63, %v1545_v9  ;;  %v713_v9 = vsel %vm707_vm11, %v1654_v2, %v1638_v47  ;;  %v672_v46 = vadd.f32 %v656_v36, %v1553_v22  ;;  %v816_v37 = vpop.permute.xlu1 %815 }
 0x17a   : > { %v714_v22 = vsel %vm707_vm11, %v1656_v3, %v1644_v52  ;;  %v673_v47 = vadd.f32 %v657_v17, %v1559_v28  ;;  %v658_v32 = vsel %vm650_vm10, %v1650_v54, %v1614_v38  ;;  %v1821_v28 = vld [vmem:[#allocation10_spill] sm:$0xff] }
 0x17b   : > { %v745_v13 = vpop.permute.xlu0 %744  ;;  %v715_v3 = vsel %vm707_vm11, %v1821_v28, %v1648_v53 }
 0x17c   : > { %v768_v10 = vsel %vm764_vm12, %v745_v13, %v747_v0  ;;  %v728_v13 = vadd.f32 %v712_v58, %v671_v43 }
 0x17f   : > { %v749_v18 = vpop.permute.xlu0 %748 }
 0x180   : > { %v769_v50 = vsel %vm764_vm12, %v749_v18, %v1658_v4  ;;  %v729_v18 = vadd.f32 %v713_v9, %v672_v46 }
 0x181   : > { %v785_v14 = vadd.f32 %v769_v50, %v728_v13 }
 0x183   : > { %v1668_v19 = vpop.permute.xlu0 %752 }
 0x184   : > { %v770_v51 = vsel %vm764_vm12, %v1668_v19, %v1662_v6 }
 0x185   : > { %v786_v2 = vadd.f32 %v770_v51, %v729_v18 }
 0x187   : > { %v1670_v21 = vpop.permute.xlu0 %756 }
 0x188   : > { %v771_v6 = vsel %vm764_vm12, %v1670_v21, %v1664_v11 }
 0x18b   : > { %v1676_v26 = vpop.permute.xlu0 %760 }
 0x18c   : > { %v772_v11 = vsel %vm764_vm12, %v1676_v26, %v1823_v56 }
 0x18f   : > { %v790_v42 = vpop.permute.xlu0 %789 }
 0x190   : > { %v822_v55 = vsel %vm821_vm13, %v790_v42, %v792_v15  ;;  %v727_v15 = vadd.f32 %v711_v48, %v670_v41 }
 0x191   : > { %v838_v33 = vadd.f32 %v822_v55, %v781_v1  ;;  %v730_v55 = vadd.f32 %v714_v22, %v673_v47 }
 0x192   : > { %v784_v62 = vadd.f32 %v768_v10, %v727_v15 }
 0x193   : > { %v846_v30 = vmul.f32 0.04, %v838_v33  ;;  %v794_v7 = vpop.permute.xlu0 %793  ;;  %v674_v33 = vadd.f32 %v658_v32, %v1822_v23 }
 0x194   : > { %v823_v45 = vsel %vm821_vm13, %v794_v7, %v796_v20 }
 0x195   : > { %854 = vst [vmem:[%s1696_s28] sm:$0xff] %v846_v30  ;;  %v839_v31 = vadd.f32 %v823_v45, %v782_v57  ;;  %v731_v40 = vadd.f32 %v715_v3, %v674_v33  ;;  %v820_v30 = vpop.permute.xlu1 %819 }
 0x197   : > { %v847_v5 = vmul.f32 0.04, %v839_v31  ;;  %v798_v35 = vpop.permute.xlu0 %797  ;;  %v788_v53 = vadd.f32 %v772_v11, %v731_v40 }
 0x198   : > { %v824_v49 = vsel %vm821_vm13, %v798_v35, %v800_v27 }
 0x199   : > { %855 = vst [vmem:[%s1696_s28 + $0x8] sm:$0xff] %v847_v5  ;;  %v840_v20 = vadd.f32 %v824_v49, %v783_v60 }
 0x19b   : > { %v848_v24 = vmul.f32 0.04, %v840_v20  ;;  %v802_v25 = vpop.permute.xlu0 %801 }
 0x19c   : > { %v825_v0 = vsel %vm821_vm13, %v802_v25, %v804_v44  ;;  %v787_v44 = vadd.f32 %v771_v6, %v730_v55 }
 0x19d   : > { %856 = vst [vmem:[%s1696_s28 + $0x10] sm:$0xff] %v848_v24  ;;  %v841_v27 = vadd.f32 %v825_v0, %v784_v62 }
 0x19f   : > { %v849_v61 = vmul.f32 0.04, %v841_v27  ;;  %v806_v1 = vpop.permute.xlu0 %805 }
 0x1a0   : > { %v826_v4 = vsel %vm821_vm13, %v806_v1, %v808_v8 }
 0x1a1   : > { %857 = vst [vmem:[%s1696_s28 + $0x18] sm:$0xff] %v849_v61  ;;  %v842_v42 = vadd.f32 %v826_v4, %v785_v14 }
 0x1a3   : > { %v850_v16 = vmul.f32 0.04, %v842_v42  ;;  %v810_v39 = vpop.permute.xlu0 %809 }
 0x1a4   : > { %v827_v19 = vsel %vm821_vm13, %v810_v39, %v812_v29 }
 0x1a5   : > { %858 = vst [vmem:[%s1696_s28 + $0x20] sm:$0xff] %v850_v16  ;;  %v843_v52 = vadd.f32 %v827_v19, %v786_v2 }
 0x1a7   : > { %v851_v38 = vmul.f32 0.04, %v843_v52  ;;  %v814_v54 = vpop.permute.xlu0 %813 }
 0x1a8   : > { %v828_v21 = vsel %vm821_vm13, %v814_v54, %v816_v37 }
 0x1a9   : > { %859 = vst [vmem:[%s1696_s28 + $0x28] sm:$0xff] %v851_v38  ;;  %v844_v57 = vadd.f32 %v828_v21, %v787_v44 }
 0x1ab   : > { %v852_v7 = vmul.f32 0.04, %v844_v57  ;;  %v818_v12 = vpop.permute.xlu0 %817 }
 0x1ac   : > { %v829_v34 = vsel %vm821_vm13, %v818_v12, %v820_v30 }
 0x1ad   : > { %860 = vst [vmem:[%s1696_s28 + $0x30] sm:$0xff] %v852_v7  ;;  %v845_v45 = vadd.f32 %v829_v34, %v788_v53 }
 0x1af   : > { %v853_v26 = vmul.f32 0.04, %v845_v45 }
 0x1b1   : > { %861 = vst [vmem:[%s1696_s28 + $0x38] sm:$0xff] %v853_v26 }
 0x1b2   : > { %1096 = shalt.err (!%p1093_p6)
}
 0x1b3   : > { %s1097_s17 = scalar_lea.hbm %s1759_s4, 1024  ;;  %s1101_s18 = scalar_lea.hbm %s1811_s1, 2048 }
 0x1b4   : > { %p1098_p7 = scmp.ne.s32.totalorder %s1759_s4, %s1097_s17  ;;  %p1102_p13 = scmp.lt.s32.totalorder %s1759_s4, %s1811_s1 }
 0x1b5   : > { %p1103_p2 = scmp.lt.s32.totalorder %s1101_s18, %s1097_s17 }
 0x1b6   : > { %p1099_p10 = pnand %p1098_p7, %p1238_p9 }
 0x1b7   : > { %p1104_p8 = por %p1103_p2, %p1102_p13 }
 0x1b8   : > { %p1100_p4 = pneg %p1099_p10 }
 0x1ba   : > { %p1105_p12 = pnand %p1104_p8, %p1100_p4 }
 0x1bc   : > { %1108 = shalt.err (!%p1105_p12)
}
 0x1bd   : > { %s1175_s26 = smov 128   ;;  %s1176_s27 = smov 8  }
 0x1be   : > { %985 = dma.vmem_to_hbm [thread:$0]  (%p1238_p9), %s1761_s29, 1024, %s1759_s4, %s863_s5, %s1175_s26, %s1175_s26, %s1176_s27  }
 0x1bf PF: > { %s894_s28 = sand.u32 1, %s1143_s6   ;;  %p1824_p0 = scmp.ge.s32.totalorder %s1163_s11, 2 }
 0x1c0   : > { %s895_s30 = scalar_lea.sflag [#allocation5], %s894_s28 }
 0x1c1   : > { %p992_p1 = pnand %p1824_p0, %p1245_p11 }
 0x1c3   : > { %p993_p3 = pneg %p992_p1 }
 0x1c5   : > { %1138 = dma.done.wait (%p993_p3), %s895_s30, 1024  }
 0x1c6   : > { %1140 = vsyncadd (%p993_p3), %s895_s30, 4294966272  ;;  %s17_s11 = sadd.s32 1, %s1163_s11   ;;  %s1825_s6 = smov %s1147_s7 }
 0x1c7   : > { %p14_p5 = scmp.ge.s32.totalorder %s17_s11, 4   ;;  %s1826_s7 = smov %s1151_s8 }
 0x1c8   : > { %s1827_s8 = smov %s1243_s20  ;;  %s1828_s9 = smov %s1159_s10 }
 0x1c9   : > { %s1829_s10 = smov %s1831_s14  ;;  %16 = sbr.rel (!%p14_p5) target bundleno = 6 (0x6), region = 69 }
 0x1ce   :  { %900 = vsyncpa [#allocation4], 1 }
 0x1cf   :  { %902 = vsyncpa [#allocation4 + $0x1], 1 }
 0x1d0   :  { %903 = vsyncpa [#allocation5], 1 }
 0x1d1   :  { %905 = vsyncpa [#allocation5 + $0x1], 1 }

</bundles_post_ra>
